<compile_context>
chip_gen: v6e
topology: v6e:2x2x1
jax: 0.10.0
libtpu: 0.0.40
codegen_flags: <defaults>
</compile_context>

<pallas_src>
import functools

import jax
import jax.numpy as jnp
from jax import lax
from jax.experimental import pallas as pl
from jax.experimental.pallas import tpu as pltpu

LMAX = 2                        # spherical harmonics specialized for lmax = 2
SH_DIM = (LMAX + 1) ** 2        # 9
_LANE = 128
_VMEM_LIMIT = 16 * 1024 * 1024  # kernel needs ~1-2 MiB; leave headroom on v7x


def _round_up(n, m):
    return ((n + m - 1) // m) * m


def _choose_tile(n_rows, *, target=2048, min_steps=4):
    """Lane-axis tile size (multiple of 128).

    Aims for >= min_steps grid steps so the "parallel" axis can be split across
    v7x's two TensorCores, capped at `target` lanes (bigger tiles amortize the
    ~0.35us per-step overhead; footprint stays tiny after input/output packing).
    Returns (tile, padded_rows).
    """
    n_pad = _round_up(max(n_rows, 1), _LANE)
    tile = max(_LANE, min(target, _round_up(n_pad // min_steps, _LANE)))
    n_pad = _round_up(n_pad, tile)
    return tile, n_pad


# ----------------------------------------------------------------------------
# Fused per-edge kernel (lane-dense [features, edges] layout):
#   geometry (SH + cosine radial basis) -> radial MLP gate -> gated message.
#   One packed input slab, one packed output slab per tile.
# ----------------------------------------------------------------------------
def _fused_edge_kernel(in_ref,
                       w_fc1_ref, b_fc1_ref, w_fc2_ref, b_fc2_ref,
                       w_fc3_ref, b_fc3_ref, w_msg_ref, b_msg_ref,
                       out_ref, *, max_radius, nbasis, x_dim, ea_dim):
    f32 = jnp.float32
    bf16 = jnp.bfloat16

    blk = in_ref[...]                       # [6 + x_dim + ea_dim, T]  (f32)
    dx = blk[0:1] - blk[3:4]                # pos_src - pos_dst, per component
    dy = blk[1:2] - blk[4:5]
    dz = blk[2:3] - blk[5:6]
    x_ea = blk[6:]                          # [x_dim + ea_dim, T] (x_src | edge_attr)
    ea_in = blk[6 + x_dim:]                 # [ea_dim, T]

    # --- edge geometry (pure VPU/EUP; no cross-sublane reduction needed) ---
    r2 = dx * dx + dy * dy + dz * dz        # [1, T]
    inv_r = lax.rsqrt(r2 + 1e-24)           # EUP slot
    r = r2 * inv_r                          # ~= |vec|
    x = dx * inv_r
    y = dy * inv_r
    z = dz * inv_r
    s3, s5, s15 = 3.0 ** 0.5, 5.0 ** 0.5, 15.0 ** 0.5
    # e3nn real SH, 'component' normalization, normalized input, lmax = 2.
    sh = jnp.concatenate([
        jnp.ones_like(x),                   # l = 0
        s3 * x, s3 * y, s3 * z,             # l = 1
        s15 * x * z,                        # l = 2
        s15 * x * y,
        s5 * (y * y - 0.5 * (x * x + z * z)),
        s15 * y * z,
        (s15 / 2.0) * (z * z - x * x),
    ], axis=0)                              # [9, T]

    # soft_one_hot_linspace(r, 0, max_radius, nbasis, basis='cosine',
    #                       cutoff=True) * sqrt(nbasis)
    step = max_radius / (nbasis + 1)
    inv_step = 1.0 / step                   # python const
    t = r.shape[1]
    centers = (lax.broadcasted_iota(jnp.int32, (nbasis, t), 0).astype(f32)
               + 1.0) * step                # [nbasis, T]
    diff = (r - centers) * inv_step         # [nbasis, T]
    inside = jnp.logical_and(diff > -1.0, diff < 1.0)
    emb = jnp.where(inside, jnp.cos((jnp.pi / 2.0) * diff), 0.0)
    emb = emb * (float(nbasis) ** 0.5)      # [nbasis, T]

    # --- radial MLP -> gate (bf16 operands, f32 accumulation) ---
    h = jnp.dot(w_fc1_ref[...], emb.astype(bf16),
                preferred_element_type=f32) + b_fc1_ref[...]
    h = jnp.maximum(h, 0.0)
    h = jnp.dot(w_fc2_ref[...], h.astype(bf16),
                preferred_element_type=f32) + b_fc2_ref[...]
    h = jnp.maximum(h, 0.0)
    gate = jnp.dot(w_fc3_ref[...], h.astype(bf16),
                   preferred_element_type=f32) + b_fc3_ref[...]     # [hidden, T]

    # --- fused message matmul: single resident [hidden, x+ea+sh] weight ---
    feat = jnp.concatenate([x_ea, sh], axis=0).astype(bf16)         # [K, T]
    msg = jnp.dot(w_msg_ref[...], feat,
                  preferred_element_type=f32) + b_msg_ref[...]      # [hidden, T]
    # TODO(synk): e3nn Gate applies a nonlinearity to the gate scalars; this
    # surrogate multiplies by the raw linear gate.
    msg = msg * gate

    # single lane-dense store of the packed output slab
    out_ref[...] = jnp.concatenate([ea_in, sh, emb, msg], axis=0)


def fused_edge_pipeline(pos_src, pos_dst, x_src, edge_attr_in,
                        w_fc1, b_fc1, w_fc2, b_fc2, w_fc3, b_fc3,
                        w_msg, b_msg, *, max_radius, number_of_basis,
                        target_tile=2048):
    E = pos_src.shape[0]
    x_dim = x_src.shape[1]
    ea_dim = edge_attr_in.shape[1]
    nb = number_of_basis
    hidden = w_msg.shape[0]

    tile_e, E_pad = _choose_tile(E, target=target_tile)

    # Pack all per-edge inputs into ONE lane-dense [features, edges] slab.
    packed = jnp.concatenate(
        [pos_src, pos_dst, x_src, edge_attr_in], axis=1).astype(jnp.float32)
    packed = packed.T                                   # [6+x_dim+ea_dim, E]
    packed = jnp.pad(packed, ((0, 0), (0, E_pad - E)))

    f_in = 6 + x_dim + ea_dim
    f_out = ea_dim + SH_DIM + nb + hidden

    def lane_spec(rows):
        return pl.BlockSpec((rows, tile_e), lambda i: (0, i))

    def resident(shape):
        return pl.BlockSpec(shape, lambda i: (0, 0))

    kernel = functools.partial(_fused_edge_kernel, max_radius=max_radius,
                               nbasis=nb, x_dim=x_dim, ea_dim=ea_dim)
    # NOTE: if DMA is still exposed at these tile sizes, bumping the input spec
    # to pipeline_mode=pl.Buffered(3) is the next knob; not needed here.
    out = pl.pallas_call(
        kernel,
        out_shape=jax.ShapeDtypeStruct((f_out, E_pad), jnp.float32),
        grid=(E_pad // tile_e,),
        in_specs=[lane_spec(f_in),
                  resident(w_fc1.shape), resident(b_fc1.shape),
                  resident(w_fc2.shape), resident(b_fc2.shape),
                  resident(w_fc3.shape), resident(b_fc3.shape),
                  resident(w_msg.shape), resident(b_msg.shape)],
        out_specs=lane_spec(f_out),
        compiler_params=pltpu.CompilerParams(
            dimension_semantics=("parallel",),
            vmem_limit_bytes=_VMEM_LIMIT),
    )(packed, w_fc1, b_fc1, w_fc2, b_fc2, w_fc3, b_fc3, w_msg, b_msg)

    edge_attr = out[:ea_dim + SH_DIM, :E].T             # [E, ea_dim + 9]
    emb = out[ea_dim + SH_DIM:ea_dim + SH_DIM + nb, :E].T   # [E, nb]
    msg = out[ea_dim + SH_DIM + nb:, :E].T              # [E, hidden]
    return edge_attr, emb, msg


# ----------------------------------------------------------------------------
# Node readout kernel (lane-dense): out = W_out @ [x | node_attr | agg] + b
# ----------------------------------------------------------------------------
def _node_readout_kernel(in_ref, w_ref, b_ref, o_ref):
    o_ref[...] = (jnp.dot(w_ref[...], in_ref[...].astype(jnp.bfloat16),
                          preferred_element_type=jnp.float32) + b_ref[...])


def node_readout(x, node_attr, agg, w_out, b_out, *, target_tile=2048):
    N = x.shape[0]
    out_dim = w_out.shape[0]
    tile_n, N_pad = _choose_tile(N, target=target_tile)

    slab = jnp.concatenate([x, node_attr, agg], axis=1).astype(jnp.float32).T
    slab = jnp.pad(slab, ((0, 0), (0, N_pad - N)))      # [K_out, N_pad]
    k_out = slab.shape[0]

    out = pl.pallas_call(
        _node_readout_kernel,
        out_shape=jax.ShapeDtypeStruct((out_dim, N_pad), jnp.float32),
        grid=(N_pad // tile_n,),
        in_specs=[pl.BlockSpec((k_out, tile_n), lambda i: (0, i)),
                  pl.BlockSpec(w_out.shape, lambda i: (0, 0)),
                  pl.BlockSpec(b_out.shape, lambda i: (0, 0))],
        out_specs=pl.BlockSpec((out_dim, tile_n), lambda i: (0, i)),
        compiler_params=pltpu.CompilerParams(
            dimension_semantics=("parallel",),
            vmem_limit_bytes=_VMEM_LIMIT),
    )(slab, w_out, b_out)
    return out[:, :N].T                                 # [N, out_dim]


# ----------------------------------------------------------------------------
# Embedding module (JAX/Pallas)
# ----------------------------------------------------------------------------
class Embedding:
    def __init__(self, *, node_in_dim, node_attr_dim, edge_attr_dim, node_out_dim,
                 lmax, mul, max_radius, number_of_basis, num_neighbors, use_forces,
                 key):
        assert lmax == LMAX, "spherical harmonics kernel is specialized for lmax=2"
        self.lmax = lmax
        self.max_radius = float(max_radius)
        self.number_of_basis = int(number_of_basis)
        self.num_neighbors = float(num_neighbors)
        self.use_forces = use_forces

        x_dim = node_in_dim + (3 if use_forces else 0)
        hidden = mul
        ks = jax.random.split(key, 5)

        def init_w(k, fan_out, fan_in):
            w = jax.random.normal(k, (fan_out, fan_in), jnp.float32) / (fan_in ** 0.5)
            return w.astype(jnp.bfloat16)   # bf16 MXU operands, f32 accumulate

        # radial MLP: fc_neurons = [number_of_basis, mul, 2*mul] -> gate(hidden)
        # weights stored [out, in] so the lane-dense kernel does W @ feat directly.
        self.w_fc1 = init_w(ks[0], mul, number_of_basis)
        self.b_fc1 = jnp.zeros((mul, 1), jnp.float32)
        self.w_fc2 = init_w(ks[1], 2 * mul, mul)
        self.b_fc2 = jnp.zeros((2 * mul, 1), jnp.float32)
        self.w_fc3 = init_w(ks[2], hidden, 2 * mul)
        self.b_fc3 = jnp.zeros((hidden, 1), jnp.float32)

        # per-edge message projection over the fused K = (x | edge_attr | sh)
        self.w_msg = init_w(ks[3], hidden, x_dim + edge_attr_dim + SH_DIM)
        self.b_msg = jnp.zeros((hidden, 1), jnp.float32)

        # node readout over the fused K = (x | node_attr | aggregated messages)
        self.w_out = init_w(ks[4], node_out_dim, x_dim + node_attr_dim + hidden)
        self.b_out = jnp.zeros((node_out_dim, 1), jnp.float32)

        self.x_dim = x_dim
        self.hidden = hidden
        self.node_out_dim = node_out_dim

    def __call__(self, data_edges, data_bonds):
        # matches the torch loop: the *last* dict's 'batch' (or zeros) wins.
        batch = None
        for d in [data_edges, data_bonds]:
            if 'batch' in d:
                batch = d['batch']
            else:
                batch = jnp.zeros((d['pos'].shape[0],), dtype=jnp.int32)

        edge_src = data_edges['edge_index'][0]
        edge_dst = data_edges['edge_index'][1]
        pos = data_edges['pos']

        if self.use_forces:
            x = jnp.concatenate([data_edges['x'], data_edges['forces']], axis=1)
        else:
            x = data_edges['x']
        node_attr = data_edges['node_attr']

        # TODO(synk): index gathers stay in JAX glue (in-kernel gather would put
        # sublane-shuffle work on the XLU; only worthwhile for small graphs).
        pos_src = jnp.take(pos, edge_src, axis=0)
        pos_dst = jnp.take(pos, edge_dst, axis=0)
        x_src = jnp.take(x, edge_src, axis=0)

        edge_attr, edge_length_embedding, msg = fused_edge_pipeline(
            pos_src, pos_dst, x_src, data_edges['edge_attr'],
            self.w_fc1, self.b_fc1, self.w_fc2, self.b_fc2,
            self.w_fc3, self.b_fc3, self.w_msg, self.b_msg,
            max_radius=self.max_radius, number_of_basis=self.number_of_basis)

        # TODO(synk): scatter-sum over dynamic edge_dst stays in JAX glue.
        num_nodes = pos.shape[0]
        agg = jax.ops.segment_sum(msg, edge_dst, num_segments=num_nodes)
        agg = agg / (self.num_neighbors ** 0.5)                 # [N, hidden]

        embed_on_edges = node_readout(x, node_attr, agg, self.w_out, self.b_out)

        return (embed_on_edges, node_attr, edge_src, edge_dst,
                edge_attr, edge_length_embedding, batch)


# ----------------------------------------------------------------------------
# Pure-JAX reference of the same surrogate (f32 activations, same bf16 weights)
# ----------------------------------------------------------------------------
def _reference_forward(model, data_edges):
    edge_src = data_edges['edge_index'][0]
    edge_dst = data_edges['edge_index'][1]
    pos = data_edges['pos']
    if model.use_forces:
        x = jnp.concatenate([data_edges['x'], data_edges['forces']], axis=1)
    else:
        x = data_edges['x']
    node_attr = data_edges['node_attr']

    vec = pos[edge_src] - pos[edge_dst]
    r2 = jnp.sum(vec * vec, axis=1, keepdims=True)
    inv_r = lax.rsqrt(r2 + 1e-24)
    r = r2 * inv_r
    u = vec * inv_r
    ux, uy, uz = u[:, 0:1], u[:, 1:2], u[:, 2:3]
    s3, s5, s15 = 3.0 ** 0.5, 5.0 ** 0.5, 15.0 ** 0.5
    sh = jnp.concatenate([
        jnp.ones_like(ux), s3 * ux, s3 * uy, s3 * uz,
        s15 * ux * uz, s15 * ux * uy,
        s5 * (uy * uy - 0.5 * (ux * ux + uz * uz)),
        s15 * uy * uz, (s15 / 2.0) * (uz * uz - ux * ux)], axis=1)
    ea = jnp.concatenate([data_edges['edge_attr'], sh], axis=1)

    step = model.max_radius / (model.number_of_basis + 1)
    centers = (jnp.arange(model.number_of_basis, dtype=jnp.float32) + 1.0) * step
    diff = (r - centers[None, :]) / step
    inside = jnp.logical_and(diff > -1.0, diff < 1.0)
    emb = jnp.where(inside, jnp.cos((jnp.pi / 2.0) * diff), 0.0)
    emb = emb * (float(model.number_of_basis) ** 0.5)

    w = lambda a: a.astype(jnp.float32)
    h = jax.nn.relu(emb @ w(model.w_fc1).T + model.b_fc1.T)
    h = jax.nn.relu(h @ w(model.w_fc2).T + model.b_fc2.T)
    gate = h @ w(model.w_fc3).T + model.b_fc3.T
    feat = jnp.concatenate([x[edge_src], data_edges['edge_attr'], sh], axis=1)
    msg = (feat @ w(model.w_msg).T + model.b_msg.T) * gate

    agg = jax.ops.segment_sum(msg, edge_dst, num_segments=pos.shape[0])
    agg = agg / (model.num_neighbors ** 0.5)
    slab = jnp.concatenate([x, node_attr, agg], axis=1)
    embed = slab @ w(model.w_out).T + model.b_out.T
    return embed, ea, emb


# ----------------------------------------------------------------------------
if __name__ == "__main__":
    key = jax.random.PRNGKey(0)
    k_pos, k_x, k_f, k_na, k_ea, k_ei, k_params = jax.random.split(key, 7)

    N, E = 16, 32               # nodes, edges
    node_in_dim = 8             # irreps_node_input dim (e.g. "8x0e")
    node_attr_dim = 4
    edge_attr_dim = 4
    node_out_dim = 16
    mul = 16
    number_of_basis = 8
    max_radius = 2.5
    num_neighbors = 4.0
    use_forces = True

    pos = jax.random.uniform(k_pos, (N, 3), jnp.float32) * 2.0
    x = jax.random.normal(k_x, (N, node_in_dim), jnp.float32)
    forces = jax.random.normal(k_f, (N, 3), jnp.float32)
    node_attr = jax.random.normal(k_na, (N, node_attr_dim), jnp.float32)
    edge_attr_in = jax.random.normal(k_ea, (E, edge_attr_dim), jnp.float32)
    edge_index = jax.random.randint(k_ei, (2, E), 0, N, dtype=jnp.int32)

    data_edges = {
        'pos': pos, 'x': x, 'forces': forces, 'node_attr': node_attr,
        'edge_attr': edge_attr_in, 'edge_index': edge_index,
    }
    data_bonds = {'pos': pos}

    model = Embedding(
        node_in_dim=node_in_dim, node_attr_dim=node_attr_dim,
        edge_attr_dim=edge_attr_dim, node_out_dim=node_out_dim,
        lmax=LMAX, mul=mul, max_radius=max_radius,
        number_of_basis=number_of_basis, num_neighbors=num_neighbors,
        use_forces=use_forces, key=k_params)

    out = model(data_edges, data_bonds)
    out = jax.block_until_ready(out)

    embed, na, es, ed, ea, elb, batch = out
    assert embed.shape == (N, node_out_dim)
    assert ea.shape == (E, edge_attr_dim + SH_DIM)
    assert elb.shape == (E, number_of_basis)
    assert batch.shape == (N,)
    assert bool(jnp.all(jnp.isfinite(embed)))

    # numeric sanity check against the pure-JAX reference
    embed_ref, ea_ref, elb_ref = _reference_forward(model, data_edges)
    assert float(jnp.max(jnp.abs(ea - ea_ref))) < 2e-3
    assert float(jnp.max(jnp.abs(elb - elb_ref))) < 2e-3
    rel = (float(jnp.max(jnp.abs(embed - embed_ref)))
           / (float(jnp.max(jnp.abs(embed_ref))) + 1e-6))
    assert rel < 0.1, f"relative error too large: {rel}"

    print("KERNEL_OK")
</pallas_src>

<mosaic_0001>
module attributes {stable_mosaic.version = 11 : i64} {
  func.func @_fused_edge_kernel(%arg0: i32, %arg1: memref<21x128xf32, #tpu.memory_space<vmem>>, %arg2: memref<16x8xbf16, #tpu.memory_space<vmem>>, %arg3: memref<16x1xf32, #tpu.memory_space<vmem>>, %arg4: memref<32x16xbf16, #tpu.memory_space<vmem>>, %arg5: memref<32x1xf32, #tpu.memory_space<vmem>>, %arg6: memref<16x32xbf16, #tpu.memory_space<vmem>>, %arg7: memref<16x1xf32, #tpu.memory_space<vmem>>, %arg8: memref<16x24xbf16, #tpu.memory_space<vmem>>, %arg9: memref<16x1xf32, #tpu.memory_space<vmem>>, %arg10: memref<37x128xf32, #tpu.memory_space<vmem>>) attributes {dimension_semantics = [#tpu.dimension_semantics<parallel>], iteration_bounds = array<i64: 1>, scalar_prefetch = 0 : i64, scratch_operands = 0 : i64, tpu.core_type = #tpu.core_type<tc>, window_params = [{transform_indices = @transform_0, window_bounds = array<i64: 21, 128>}, {pipeline_mode = #tpu.pipeline_mode<synchronous>, transform_indices = @transform_1, window_bounds = array<i64: 16, 8>}, {pipeline_mode = #tpu.pipeline_mode<synchronous>, transform_indices = @transform_2, window_bounds = array<i64: 16, 1>}, {pipeline_mode = #tpu.pipeline_mode<synchronous>, transform_indices = @transform_3, window_bounds = array<i64: 32, 16>}, {pipeline_mode = #tpu.pipeline_mode<synchronous>, transform_indices = @transform_4, window_bounds = array<i64: 32, 1>}, {pipeline_mode = #tpu.pipeline_mode<synchronous>, transform_indices = @transform_5, window_bounds = array<i64: 16, 32>}, {pipeline_mode = #tpu.pipeline_mode<synchronous>, transform_indices = @transform_6, window_bounds = array<i64: 16, 1>}, {pipeline_mode = #tpu.pipeline_mode<synchronous>, transform_indices = @transform_7, window_bounds = array<i64: 16, 24>}, {pipeline_mode = #tpu.pipeline_mode<synchronous>, transform_indices = @transform_8, window_bounds = array<i64: 16, 1>}, {transform_indices = @transform_9, window_bounds = array<i64: 37, 128>}]} {
    %c0 = arith.constant 0 : index
    %c0_0 = arith.constant 0 : index
    %0 = vector.load %arg1[%c0, %c0_0] : memref<21x128xf32, #tpu.memory_space<vmem>>, vector<21x128xf32>
    %1 = vector.extract_strided_slice %0 {offsets = [0, 0], sizes = [1, 128], strides = [1, 1]} : vector<21x128xf32> to vector<1x128xf32>
    %2 = vector.extract_strided_slice %0 {offsets = [3, 0], sizes = [1, 128], strides = [1, 1]} : vector<21x128xf32> to vector<1x128xf32>
    %3 = arith.subf %1, %2 : vector<1x128xf32>
    %4 = vector.extract_strided_slice %0 {offsets = [1, 0], sizes = [1, 128], strides = [1, 1]} : vector<21x128xf32> to vector<1x128xf32>
    %5 = vector.extract_strided_slice %0 {offsets = [4, 0], sizes = [1, 128], strides = [1, 1]} : vector<21x128xf32> to vector<1x128xf32>
    %6 = arith.subf %4, %5 : vector<1x128xf32>
    %7 = vector.extract_strided_slice %0 {offsets = [2, 0], sizes = [1, 128], strides = [1, 1]} : vector<21x128xf32> to vector<1x128xf32>
    %8 = vector.extract_strided_slice %0 {offsets = [5, 0], sizes = [1, 128], strides = [1, 1]} : vector<21x128xf32> to vector<1x128xf32>
    %9 = arith.subf %7, %8 : vector<1x128xf32>
    %10 = vector.extract_strided_slice %0 {offsets = [6, 0], sizes = [15, 128], strides = [1, 1]} : vector<21x128xf32> to vector<15x128xf32>
    %11 = vector.extract_strided_slice %0 {offsets = [17, 0], sizes = [4, 128], strides = [1, 1]} : vector<21x128xf32> to vector<4x128xf32>
    %12 = arith.mulf %3, %3 : vector<1x128xf32>
    %13 = arith.mulf %6, %6 : vector<1x128xf32>
    %14 = arith.addf %12, %13 : vector<1x128xf32>
    %15 = arith.mulf %9, %9 : vector<1x128xf32>
    %16 = arith.addf %14, %15 : vector<1x128xf32>
    %cst = arith.constant 1.000000e-24 : f32
    %17 = vector.broadcast %cst : f32 to vector<1x128xf32>
    %18 = arith.addf %16, %17 : vector<1x128xf32>
    %19 = math.rsqrt %18 : vector<1x128xf32>
    %20 = arith.mulf %16, %19 : vector<1x128xf32>
    %21 = arith.mulf %3, %19 : vector<1x128xf32>
    %22 = arith.mulf %6, %19 : vector<1x128xf32>
    %23 = arith.mulf %9, %19 : vector<1x128xf32>
    %cst_1 = arith.constant 1.000000e+00 : f32
    %24 = vector.broadcast %cst_1 : f32 to vector<1x128xf32>
    %cst_2 = arith.constant 1.73205078 : f32
    %25 = vector.broadcast %cst_2 : f32 to vector<1x128xf32>
    %26 = arith.mulf %25, %21 : vector<1x128xf32>
    %cst_3 = arith.constant 1.73205078 : f32
    %27 = vector.broadcast %cst_3 : f32 to vector<1x128xf32>
    %28 = arith.mulf %27, %22 : vector<1x128xf32>
    %cst_4 = arith.constant 1.73205078 : f32
    %29 = vector.broadcast %cst_4 : f32 to vector<1x128xf32>
    %30 = arith.mulf %29, %23 : vector<1x128xf32>
    %cst_5 = arith.constant 3.87298346 : f32
    %31 = vector.broadcast %cst_5 : f32 to vector<1x128xf32>
    %32 = arith.mulf %31, %21 : vector<1x128xf32>
    %33 = arith.mulf %32, %23 : vector<1x128xf32>
    %cst_6 = arith.constant 3.87298346 : f32
    %34 = vector.broadcast %cst_6 : f32 to vector<1x128xf32>
    %35 = arith.mulf %34, %21 : vector<1x128xf32>
    %36 = arith.mulf %35, %22 : vector<1x128xf32>
    %37 = arith.mulf %22, %22 : vector<1x128xf32>
    %38 = arith.mulf %21, %21 : vector<1x128xf32>
    %39 = arith.mulf %23, %23 : vector<1x128xf32>
    %40 = arith.addf %38, %39 : vector<1x128xf32>
    %cst_7 = arith.constant 5.000000e-01 : f32
    %41 = vector.broadcast %cst_7 : f32 to vector<1x128xf32>
    %42 = arith.mulf %41, %40 : vector<1x128xf32>
    %43 = arith.subf %37, %42 : vector<1x128xf32>
    %cst_8 = arith.constant 2.23606801 : f32
    %44 = vector.broadcast %cst_8 : f32 to vector<1x128xf32>
    %45 = arith.mulf %44, %43 : vector<1x128xf32>
    %cst_9 = arith.constant 3.87298346 : f32
    %46 = vector.broadcast %cst_9 : f32 to vector<1x128xf32>
    %47 = arith.mulf %46, %22 : vector<1x128xf32>
    %48 = arith.mulf %47, %23 : vector<1x128xf32>
    %49 = arith.mulf %23, %23 : vector<1x128xf32>
    %50 = arith.mulf %21, %21 : vector<1x128xf32>
    %51 = arith.subf %49, %50 : vector<1x128xf32>
    %cst_10 = arith.constant 1.93649173 : f32
    %52 = vector.broadcast %cst_10 : f32 to vector<1x128xf32>
    %53 = arith.mulf %52, %51 : vector<1x128xf32>
    %54 = tpu.concatenate %24, %26, %28, %30, %33, %36, %45, %48, %53 in 0 : vector<1x128xf32>, vector<1x128xf32>, vector<1x128xf32>, vector<1x128xf32>, vector<1x128xf32>, vector<1x128xf32>, vector<1x128xf32>, vector<1x128xf32>, vector<1x128xf32> -> vector<9x128xf32>
    %55 = tpu.iota {dimensions = array<i32: 0>} : vector<8x128xi32>
    %56 = arith.sitofp %55 : vector<8x128xi32> to vector<8x128xf32>
    %cst_11 = arith.constant 1.000000e+00 : f32
    %57 = vector.broadcast %cst_11 : f32 to vector<8x128xf32>
    %58 = arith.addf %56, %57 : vector<8x128xf32>
    %cst_12 = arith.constant 0.277777791 : f32
    %59 = vector.broadcast %cst_12 : f32 to vector<8x128xf32>
    %60 = arith.mulf %58, %59 : vector<8x128xf32>
    %61 = vector.broadcast %20 : vector<1x128xf32> to vector<8x128xf32>
    %62 = arith.subf %61, %60 : vector<8x128xf32>
    %cst_13 = arith.constant 3.600000e+00 : f32
    %63 = vector.broadcast %cst_13 : f32 to vector<8x128xf32>
    %64 = arith.mulf %62, %63 : vector<8x128xf32>
    %cst_14 = arith.constant -1.000000e+00 : f32
    %65 = vector.broadcast %cst_14 : f32 to vector<8x128xf32>
    %66 = arith.cmpf ogt, %64, %65 : vector<8x128xf32>
    %cst_15 = arith.constant 1.000000e+00 : f32
    %67 = vector.broadcast %cst_15 : f32 to vector<8x128xf32>
    %68 = arith.cmpf olt, %64, %67 : vector<8x128xf32>
    %69 = arith.andi %66, %68 : vector<8x128xi1>
    %cst_16 = arith.constant 1.57079637 : f32
    %70 = vector.broadcast %cst_16 : f32 to vector<8x128xf32>
    %71 = arith.mulf %70, %64 : vector<8x128xf32>
    %72 = math.cos %71 : vector<8x128xf32>
    %cst_17 = arith.constant 0.000000e+00 : f32
    %73 = vector.broadcast %cst_17 : f32 to vector<8x128xf32>
    %74 = arith.select %69, %72, %73 : vector<8x128xi1>, vector<8x128xf32>
    %cst_18 = arith.constant 2.82842708 : f32
    %75 = vector.broadcast %cst_18 : f32 to vector<8x128xf32>
    %76 = arith.mulf %74, %75 : vector<8x128xf32>
    %c0_19 = arith.constant 0 : index
    %c0_20 = arith.constant 0 : index
    %77 = vector.load %arg2[%c0_19, %c0_20] : memref<16x8xbf16, #tpu.memory_space<vmem>>, vector<16x8xbf16>
    %78 = arith.truncf %76 : vector<8x128xf32> to vector<8x128xbf16>
    %cst_21 = arith.constant dense<0.000000e+00> : vector<16x128xf32>
    %79 = tpu.matmul %77, %78, %cst_21 {dimension_numbers = #tpu.dot_dimension_numbers<[1], [0], [0], [1], [0, 0, 1, 1], [], []>} : vector<16x8xbf16>, vector<8x128xbf16>, vector<16x128xf32> -> vector<16x128xf32>
    %c0_22 = arith.constant 0 : index
    %c0_23 = arith.constant 0 : index
    %80 = vector.load %arg3[%c0_22, %c0_23] : memref<16x1xf32, #tpu.memory_space<vmem>>, vector<16x1xf32>
    %81 = vector.broadcast %80 : vector<16x1xf32> to vector<16x128xf32>
    %82 = arith.addf %79, %81 : vector<16x128xf32>
    %cst_24 = arith.constant 0.000000e+00 : f32
    %83 = vector.broadcast %cst_24 : f32 to vector<16x128xf32>
    %84 = arith.maximumf %82, %83 : vector<16x128xf32>
    %c0_25 = arith.constant 0 : index
    %c0_26 = arith.constant 0 : index
    %85 = vector.load %arg4[%c0_25, %c0_26] : memref<32x16xbf16, #tpu.memory_space<vmem>>, vector<32x16xbf16>
    %86 = arith.truncf %84 : vector<16x128xf32> to vector<16x128xbf16>
    %cst_27 = arith.constant dense<0.000000e+00> : vector<32x128xf32>
    %87 = tpu.matmul %85, %86, %cst_27 {dimension_numbers = #tpu.dot_dimension_numbers<[1], [0], [0], [1], [0, 0, 1, 1], [], []>} : vector<32x16xbf16>, vector<16x128xbf16>, vector<32x128xf32> -> vector<32x128xf32>
    %c0_28 = arith.constant 0 : index
    %c0_29 = arith.constant 0 : index
    %88 = vector.load %arg5[%c0_28, %c0_29] : memref<32x1xf32, #tpu.memory_space<vmem>>, vector<32x1xf32>
    %89 = vector.broadcast %88 : vector<32x1xf32> to vector<32x128xf32>
    %90 = arith.addf %87, %89 : vector<32x128xf32>
    %cst_30 = arith.constant 0.000000e+00 : f32
    %91 = vector.broadcast %cst_30 : f32 to vector<32x128xf32>
    %92 = arith.maximumf %90, %91 : vector<32x128xf32>
    %c0_31 = arith.constant 0 : index
    %c0_32 = arith.constant 0 : index
    %93 = vector.load %arg6[%c0_31, %c0_32] : memref<16x32xbf16, #tpu.memory_space<vmem>>, vector<16x32xbf16>
    %94 = arith.truncf %92 : vector<32x128xf32> to vector<32x128xbf16>
    %cst_33 = arith.constant dense<0.000000e+00> : vector<16x128xf32>
    %95 = tpu.matmul %93, %94, %cst_33 {dimension_numbers = #tpu.dot_dimension_numbers<[1], [0], [0], [1], [0, 0, 1, 1], [], []>} : vector<16x32xbf16>, vector<32x128xbf16>, vector<16x128xf32> -> vector<16x128xf32>
    %c0_34 = arith.constant 0 : index
    %c0_35 = arith.constant 0 : index
    %96 = vector.load %arg7[%c0_34, %c0_35] : memref<16x1xf32, #tpu.memory_space<vmem>>, vector<16x1xf32>
    %97 = vector.broadcast %96 : vector<16x1xf32> to vector<16x128xf32>
    %98 = arith.addf %95, %97 : vector<16x128xf32>
    %99 = tpu.concatenate %10, %54 in 0 : vector<15x128xf32>, vector<9x128xf32> -> vector<24x128xf32>
    %100 = arith.truncf %99 : vector<24x128xf32> to vector<24x128xbf16>
    %c0_36 = arith.constant 0 : index
    %c0_37 = arith.constant 0 : index
    %101 = vector.load %arg8[%c0_36, %c0_37] : memref<16x24xbf16, #tpu.memory_space<vmem>>, vector<16x24xbf16>
    %cst_38 = arith.constant dense<0.000000e+00> : vector<16x128xf32>
    %102 = tpu.matmul %101, %100, %cst_38 {dimension_numbers = #tpu.dot_dimension_numbers<[1], [0], [0], [1], [0, 0, 1, 1], [], []>} : vector<16x24xbf16>, vector<24x128xbf16>, vector<16x128xf32> -> vector<16x128xf32>
    %c0_39 = arith.constant 0 : index
    %c0_40 = arith.constant 0 : index
    %103 = vector.load %arg9[%c0_39, %c0_40] : memref<16x1xf32, #tpu.memory_space<vmem>>, vector<16x1xf32>
    %104 = vector.broadcast %103 : vector<16x1xf32> to vector<16x128xf32>
    %105 = arith.addf %102, %104 : vector<16x128xf32>
    %106 = arith.mulf %105, %98 : vector<16x128xf32>
    %107 = tpu.concatenate %11, %54, %76, %106 in 0 : vector<4x128xf32>, vector<9x128xf32>, vector<8x128xf32>, vector<16x128xf32> -> vector<37x128xf32>
    %c0_41 = arith.constant 0 : index
    %c0_42 = arith.constant 0 : index
    %108 = vector.load %arg10[%c0_41, %c0_42] : memref<37x128xf32, #tpu.memory_space<vmem>>, vector<37x128xf32>
    tpu.vector_store %arg10[%c0_41, %c0_42], %107 {strides = array<i32>} : memref<37x128xf32, #tpu.memory_space<vmem>>, vector<37x128xf32>,
    return
  }
  func.func @transform_0(%arg0: i32) -> (i32, i32) {
    %c0_i32 = arith.constant 0 : i32
    %c0_i32_0 = arith.constant 0 : i32
    return %c0_i32, %arg0 : i32, i32
  }
  func.func @transform_1(%arg0: i32) -> (i32, i32) {
    %c0_i32 = arith.constant 0 : i32
    %c0_i32_0 = arith.constant 0 : i32
    %c0_i32_1 = arith.constant 0 : i32
    return %c0_i32, %c0_i32_0 : i32, i32
  }
  func.func @transform_2(%arg0: i32) -> (i32, i32) {
    %c0_i32 = arith.constant 0 : i32
    %c0_i32_0 = arith.constant 0 : i32
    %c0_i32_1 = arith.constant 0 : i32
    return %c0_i32, %c0_i32_0 : i32, i32
  }
  func.func @transform_3(%arg0: i32) -> (i32, i32) {
    %c0_i32 = arith.constant 0 : i32
    %c0_i32_0 = arith.constant 0 : i32
    %c0_i32_1 = arith.constant 0 : i32
    return %c0_i32, %c0_i32_0 : i32, i32
  }
  func.func @transform_4(%arg0: i32) -> (i32, i32) {
    %c0_i32 = arith.constant 0 : i32
    %c0_i32_0 = arith.constant 0 : i32
    %c0_i32_1 = arith.constant 0 : i32
    return %c0_i32, %c0_i32_0 : i32, i32
  }
  func.func @transform_5(%arg0: i32) -> (i32, i32) {
    %c0_i32 = arith.constant 0 : i32
    %c0_i32_0 = arith.constant 0 : i32
    %c0_i32_1 = arith.constant 0 : i32
    return %c0_i32, %c0_i32_0 : i32, i32
  }
  func.func @transform_6(%arg0: i32) -> (i32, i32) {
    %c0_i32 = arith.constant 0 : i32
    %c0_i32_0 = arith.constant 0 : i32
    %c0_i32_1 = arith.constant 0 : i32
    return %c0_i32, %c0_i32_0 : i32, i32
  }
  func.func @transform_7(%arg0: i32) -> (i32, i32) {
    %c0_i32 = arith.constant 0 : i32
    %c0_i32_0 = arith.constant 0 : i32
    %c0_i32_1 = arith.constant 0 : i32
    return %c0_i32, %c0_i32_0 : i32, i32
  }
  func.func @transform_8(%arg0: i32) -> (i32, i32) {
    %c0_i32 = arith.constant 0 : i32
    %c0_i32_0 = arith.constant 0 : i32
    %c0_i32_1 = arith.constant 0 : i32
    return %c0_i32, %c0_i32_0 : i32, i32
  }
  func.func @transform_9(%arg0: i32) -> (i32, i32) {
    %c0_i32 = arith.constant 0 : i32
    %c0_i32_0 = arith.constant 0 : i32
    return %c0_i32, %arg0 : i32, i32
  }
}

</mosaic_0001>

<bundles_post_ra>
// kernel: tpu_custom_call.1
= control target key start
LH: loop header
LB: loop body
LE: loop exit
PB: predicated region body
PF: predicated region fallthrough
CT: control target
= control target key end

     0   :  { %v719_v1 = vmov 0.0   ;;  %vm720_vm0 = vmmov 0   ;;  %v721_v8 = vmov 0   ;;  %s933_s0 = inlined_call_operand.vmem [shape: f32[21,128], index: 0, kind: input, shape index: {}]   ;;  %s934_s1 = inlined_call_operand.vmem [shape: bf16[16,8], index: 1, kind: input, shape index: {}]   ;;  %s935_s2 = inlined_call_operand.vmem [shape: f32[16,1], index: 2, kind: input, shape index: {}]   ;;  %s936_s3 = inlined_call_operand.vmem [shape: bf16[32,16], index: 3, kind: input, shape index: {}]   ;;  %s937_s4 = inlined_call_operand.vmem [shape: f32[32,1], index: 4, kind: input, shape index: {}]   ;;  %s938_s5 = inlined_call_operand.vmem [shape: bf16[16,32], index: 5, kind: input, shape index: {}]   ;;  %s939_s6 = inlined_call_operand.vmem [shape: f32[16,1], index: 6, kind: input, shape index: {}]   ;;  %s940_s7 = inlined_call_operand.vmem [shape: bf16[16,24], index: 7, kind: input, shape index: {}]   ;;  %s941_s8 = inlined_call_operand.vmem [shape: f32[16,1], index: 8, kind: input, shape index: {}]   ;;  %s942_s9 = inlined_call_operand.hbm [shape: f32[37,128], index: 9, kind: output, shape index: {}]  }
   0x1   :  { %v784_v0 = vld [vmem:[%s933_s0] sm:$0xff]  ;;  %640 = vmatprep.subr.bf16.mxu0 %v719_v1  ;;  %642 = vmatprep.mubr.msk.bf16.mxu0 %vm720_vm0, %v719_v1  ;;  %v255_v10 = vld [vmem:[%s935_s2 + $0x8] sm:$0xff] }
   0x2   :  { %v38_v2 = vrot.slane %v784_v0, 3  ;;  %v254_v5 = vld [vmem:[%s935_s2] sm:$0xff]  ;;  %684 = vset.pattern.permute.xlu0 %v721_v8  ;;  %685 = vset.pattern.permute.xlu1 %v721_v8 }
   0x3   :  { %258 = vperm.xlu0 %684, %v254_v5  }
   0x4   :  { %v40_v3 = vsub.f32 %v784_v0, %v38_v2 }
   0x6   :  { %v41_v4 = vmul.f32 %v40_v3, %v40_v3 }
   0x8   :  { %v43_v6 = vrot.slane %v41_v4, 1  ;;  %v46_v7 = vrot.slane %v41_v4, 2 }
   0xa   :  { %v45_v9 = vadd.f32 %v43_v6, %v41_v4 }
   0xb   :  { %14 = vsyncpa [#allocation3], 0  ;;  %263 = vperm.xlu0 %684, %v255_v10   ;;  %v326_v13 = vld [vmem:[%s937_s4] sm:$0xff]  ;;  %v131_v14 = vlaneseq  ;;  %vm117_vm1 = vcmask 1040384   ;;  %vm119_vm2 = vcmask 1041408   ;;  %vm121_vm3 = vcmask 1042432  }
   0xc   :  { %v48_v11 = vadd.f32 %v46_v7, %v45_v9  ;;  %v424_v15 = vld [vmem:[%s939_s6] sm:$0xff]  ;;  %vm123_vm4 = vcmask 1043456   ;;  %v722_v58 = vmov 683565275   ;;  %v723_v60 = vmov 2475754826  }
   0xd   :  { %v132_v16 = vshrl.u32 %v131_v14, 7  ;;  %v506_v17 = vld [vmem:[%s941_s8] sm:$0xff]  ;;  %v724_v62 = vmov 2131351028   ;;  %v725_v2 = vmov 2102212464  }
   0xe   :  { %v49_v12 = vadd.f32 1e-24, %v48_v11  ;;  %v726_v4 = vmov 920167782   ;;  %s728_s16 = smov [#allocation2]  }
   0xf   :  { %332 = vperm.xlu0 %684, %v326_v13   ;;  %v133_v18 = vcvt.s32.f32 %v132_v16  ;;  %v138_v21 = vsub.s32 0, %v132_v16 }
  0x10   :  { %691 = vrsqrt.f32 %v49_v12 }
  0x11   :  { %v134_v19 = vadd.f32 1.0, %v133_v18 }
  0x13   :  { %428 = vperm.xlu0 %684, %v424_v15   ;;  %v135_v26 = vmul.f32 0.2777778, %v134_v19 }
  0x17   :  { %510 = vperm.xlu0 %684, %v506_v17  }
  0x1d   :  { %v692_v20 = vpop.eup %691 }
  0x1e   :  { %v51_v22 = vmul.f32 %v692_v20, %v48_v11  ;;  %v806_v23 = vmul.f32 %v692_v20, %v40_v3  ;;  %v54_v24 = vrot.slane %v692_v20, 7  ;;  %v57_v25 = vrot.slane %v692_v20, 6 }
  0x1f   :  { %v727_v11 = vmov 1326507024  }
  0x20   :  { %v808_v27 = vmul.f32 %v54_v24, %v40_v3  ;;  %v810_v28 = vmul.f32 %v57_v25, %v40_v3  ;;  %v60_v29 = vmul.f32 1.7320508, %v806_v23  ;;  %v814_v30 = vmul.f32 3.8729835, %v806_v23 }
  0x21   :  { %v139_v31 = vrot.slane %v51_v22, %v138_v21 }
  0x22   :  { %v61_v32 = vmul.f32 1.7320508, %v808_v27  ;;  %v62_v33 = vmul.f32 1.7320508, %v810_v28  ;;  %v65_v34 = vrot.slane %v810_v28, 2  ;;  %v95_v35 = vrot.slane %v60_v29, 7 }
  0x23   :  { %v140_v36 = vsub.f32 %v139_v31, %v135_v26 }
  0x24   :  { %v67_v37 = vmul.f32 %v65_v34, %v814_v30  ;;  %v98_v38 = vrot.slane %v61_v32, 7  ;;  %v101_v39 = vrot.slane %v62_v33, 7  ;;  %v118_v40 = vsel %vm117_vm1, 1.0, %v95_v35 }
  0x25   :  { %v820_v41 = vmul.f32 3.6, %v140_v36 }
  0x26   :  { %v104_v42 = vrot.slane %v67_v37, 4  ;;  %v120_v43 = vsel %vm119_vm2, %v118_v40, %v98_v38 }
  0x27   :  { %v122_v44 = vsel %vm121_vm3, %v120_v43, %v101_v39  ;;  %v824_v45 = vmul.f32 1.5707964, %v820_v41  ;;  %vm142_vm15 = vcmp.gt.f32.partialorder %v820_v41, -1.0  ;;  %vm143_vm1 = vcmp.lt.f32.partialorder %v820_v41, 1.0  ;;  %v686_v41 = vld [vmem:[%s934_s1] sm:$0xff]  }
  0x28   :  { %v827_v46 = vsel %vm123_vm4, %v122_v44, %v104_v42 }
  0x29   :  { %v149_v47 = vand.u32 2139095040, %v824_v45  ;;  %v146_v49 = vand.u32 2147483647, %v824_v45  ;;  %vm148_vm12 = vcmp.lt.s32.totalorder %v824_v45, 0 }
  0x2b   :  { %v150_v48 = vshrl.u32 %v149_v47, 23  ;;  %v153_v52 = vand.u32 8388607, %v146_v49  ;;  %vm147_vm13 = vcmp.le.f32.partialorder %v146_v49, 0.7853982 }
  0x2d   :  { %v615_v50 = vadd.s32 4294967169, %v150_v48  ;;  %v154_v55 = vor.u32 8388608, %v153_v52 }
  0x2f   :  { %v156_v51 = vadd.s32 1, %v615_v50  ;;  %v194_v13 = vshll.u32 %v154_v55, 8 }
  0x31   :  { %vm157_vm5 = vcmp.gt.s32.totalorder %v156_v51, 0 }
  0x32   :  { %v158_v53 = vsel %vm157_vm5, %v156_v51, 0 }
  0x33   :  { %v160_v54 = vand.u32 31, %v158_v53  ;;  %v159_v56 = vshrl.u32 %v158_v53, 5 }
  0x35   :  { %v161_v57 = vsub.s32 32, %v160_v54  ;;  %v163_v59 = vshll.u32 %v722_v58, %v160_v54  ;;  %v166_v61 = vshll.u32 %v723_v60, %v160_v54  ;;  %v169_v63 = vshll.u32 %v724_v62, %v160_v54 }
  0x36   :  { %v172_v3 = vshll.u32 %v725_v2, %v160_v54  ;;  %v175_v5 = vshll.u32 %v726_v4, %v160_v54  ;;  %vm178_vm6 = vcmp.lt.s32.totalorder %v159_v56, 1  ;;  %vm181_vm7 = vcmp.lt.s32.totalorder %v159_v56, 4 }
  0x37   :  { %v162_v6 = vshrl.u32 %v722_v58, %v161_v57  ;;  %v164_v7 = vshrl.u32 %v723_v60, %v161_v57  ;;  %v167_v8 = vshrl.u32 %v724_v62, %v161_v57  ;;  %v170_v9 = vshrl.u32 %v725_v2, %v161_v57 }
  0x38   :  { %v173_v10 = vshrl.u32 %v726_v4, %v161_v57  ;;  %v176_v12 = vshrl.u32 %v727_v11, %v161_v57  ;;  %vm179_vm8 = vcmp.lt.s32.totalorder %v159_v56, 2  ;;  %vm180_vm9 = vcmp.lt.s32.totalorder %v159_v56, 3 }
  0x39   :  { %v165_v14 = vor.u32 %v164_v7, %v163_v59  ;;  %v168_v15 = vor.u32 %v167_v8, %v166_v61  ;;  %v171_v16 = vor.u32 %v170_v9, %v169_v63 }
  0x3a   :  { %v174_v17 = vor.u32 %v173_v10, %v172_v3  ;;  %v177_v18 = vor.u32 %v176_v12, %v175_v5 }
  0x3b   :  { %v182_v19 = vsel %vm178_vm6, %v162_v6, %v165_v14  ;;  %v183_v20 = vsel %vm181_vm7, %v171_v16, 2102212464  ;;  %v186_v21 = vsel %vm178_vm6, %v165_v14, %v168_v15  ;;  %v190_v22 = vsel %vm178_vm6, %v168_v15, %v171_v16 }
  0x3c   :  { %v184_v24 = vsel %vm180_vm9, %v168_v15, %v183_v20  ;;  %v187_v25 = vsel %vm181_vm7, %v174_v17, 920167782  ;;  %v191_v26 = vsel %vm181_vm7, %v177_v18, 1326507024  ;;  %vm238_vm6 = vweird.f32 %v824_v45  ;;  %vm144_vm7 = vmand %vm142_vm15, %vm143_vm1 }
  0x3d   :  { %v188_v29 = vsel %vm180_vm9, %v171_v16, %v187_v25  ;;  %v192_v31 = vsel %vm180_vm9, %v174_v17, %v191_v26  ;;  %v185_v32 = vsel %vm179_vm8, %v182_v19, %v184_v24  ;;  %v73_v25 = vmul.f32 %v806_v23, %v806_v23 }
  0x3e   :  { %v189_v33 = vsel %vm179_vm8, %v186_v21, %v188_v29  ;;  %v193_v34 = vsel %vm179_vm8, %v190_v22, %v192_v31  ;;  %v201_v39 = vmul.u32 %v194_v13, %v185_v32  ;;  %vm271_vm8 = vcmask 64512  }
  0x3f   :  { %v833_v35 = vmul.u32.u64.low %v194_v13, %v193_v34  ;;  %v834_v36 = vmul.u32.u64.high %v194_v13, %v193_v34, %v833_v35  ;;  %v836_v37 = vmul.u32.u64.low %v194_v13, %v189_v33  ;;  %v837_v38 = vmul.u32.u64.high %v194_v13, %v189_v33, %v836_v37 }
  0x40   :  { %v72_v32 = vmul.f32 %v808_v27, %v808_v27  ;;  %v69_v34 = vrot.slane %v808_v27, 1  ;;  %vm125_vm9 = vcmask 1044480  }
  0x41   :  { %vm203_vm10 = vc.u32 %v834_v36, %v836_v37  ;;  %v204_v40 = vadd.s32 1, %v837_v38  ;;  %v202_v55 = vadd.s32 %v836_v37, %v834_v36  ;;  %v90_v36 = vrot.slane %v73_v25, 6 }
  0x42   :  { %v71_v37 = vmul.f32 %v69_v34, %v814_v30 }
  0x43   :  { %v205_v42 = vsel %vm203_vm10, %v204_v40, %v837_v38  ;;  %v85_v38 = vmul.f32 3.8729835, %v808_v27  ;;  %vm127_vm10 = vcmask 1045504  }
  0x44   :  { %v206_v43 = vadd.s32 %v205_v42, %v201_v39  ;;  %v86_v39 = vrot.slane %v810_v28, 1 }
  0x46   :  { %v207_v44 = vadd.s32 536870912, %v206_v43  ;;  %v88_v23 = vmul.f32 %v86_v39, %v85_v38 }
  0x48   :  { %v208_v47 = vshrl.u32 %v207_v44, 30 }
  0x4a   :  { %v209_v48 = vshll.u32 %v208_v47, 30  ;;  %v232_v8 = vsub.s32 4, %v208_v47 }
  0x4c   :  { %v210_v50 = vsub.s32 %v206_v43, %v209_v48  ;;  %v233_v10 = vsel %vm148_vm12, %v232_v8, %v208_v47  ;;  %v107_v43 = vrot.slane %v71_v37, 3  ;;  %v113_v48 = vrot.slane %v88_v23, 2  ;;  %v425_v8 = vld [vmem:[%s939_s6 + $0x8] sm:$0xff] }
  0x4d   :  { %v235_v11 = vsel %vm147_vm13, 0, %v233_v10 }
  0x4e   :  { %v212_v51 = vsub.s32 0, %v210_v50  ;;  %v239_v12 = vand.u32 3, %v235_v11 }
  0x50   :  { %v616_v52 = vmin.u32 %v212_v51, %v210_v50  ;;  %vm244_vm14 = vcmp.eq.s32.totalorder %v239_v12, 2  ;;  %vm241_vm3 = vcmp.eq.s32.totalorder %v239_v12, 0  ;;  %vm240_vm5 = vcmp.lt.s32.totalorder %v239_v12, 2 }
  0x52   :  { %v214_v53 = vclz %v616_v52 }
  0x54   :  { %v617_v54 = vadd.s32 4294967294, %v214_v53 }
  0x56   :  { %vm618_vm11 = vcmp.lt.s32.totalorder %v617_v54, 0 }
  0x57   :  { %v217_v56 = vsel %vm618_vm11, 0, %v617_v54  ;;  %vm129_vm11 = vcmask 1046528  }
  0x58   :  { %v218_v57 = vsub.s32 32, %v217_v56  ;;  %v219_v58 = vshll.u32 %v210_v50, %v217_v56  ;;  %v222_v59 = vsub.s32 4294967266, %v217_v56  ;;  %v126_v50 = vsel %vm125_vm9, %v827_v46, %v107_v43  ;;  %v35_v46 = vld [vmem:[%s933_s0 + $0x8] sm:$0xff] }
  0x59   :  { %v489_v56 = vrot.slane %v35_v46, 6 }
  0x5a   :  { %v220_v60 = vshrl.u32 %v202_v55, %v218_v57  ;;  %v223_v61 = vadd.s32 127, %v222_v59  ;;  %v36_v55 = vld [vmem:[%s933_s0 + $0x10] sm:$0x1f] }
  0x5b   :  { %v491_v57 = vrot.slane %v36_v55, 6 }
  0x5c   :  { %v221_v62 = vor.u32 %v220_v60, %v219_v58  ;;  %v224_v63 = vshll.u32 %v223_v61, 23  ;;  %v573_v58 = vrot.slane %v36_v55, 1 }
  0x5d   :  { %v492_v61 = vsel %vm119_vm2, %v489_v56, %v491_v57 }
  0x5e   :  { %v225_v2 = vor.u32 4788187, %v224_v63  ;;  %v228_v3 = vcvt.s32.f32 %v221_v62 }
  0x60   :  { %v226_v4 = vand.u32 2147483647, %v225_v2 }
  0x62   :  { %v229_v5 = vmul.f32 %v228_v3, %v226_v4 }
  0x64   :  { %v230_v6 = vxor.u32 2147483648, %v229_v5 }
  0x66   :  { %v231_v7 = vsel %vm148_vm12, %v230_v6, %v229_v5  ;;  %vm360_vm12 = vcmask 130048   ;;  %v328_v5 = vld [vmem:[%s937_s4 + $0x10] sm:$0xff]  ;;  %v329_v6 = vld [vmem:[%s937_s4 + $0x18] sm:$0xff] }
  0x67   :  { %v234_v9 = vsel %vm147_vm13, %v824_v45, %v231_v7  ;;  %v74_v45 = vmul.f32 %v810_v28, %v810_v28  ;;  %v687_v28 = vld [vmem:[%s936_s3] sm:$0xff]   ;;  %342 = vperm.xlu1 %685, %v328_v5   ;;  %v327_v7 = vld [vmem:[%s937_s4 + $0x8] sm:$0xff]  ;;  %vm523_vm13 = vcmask 195584  }
  0x68   :  { %693 = vcosq.f32 %v234_v9  ;;  %648 = vmatprep.mubr.msk.bf16.mxu1 %vm360_vm12, %v687_v28 }
  0x69   :  { %695 = vsinq.f32 %v234_v9  ;;  %v76_v26 = vrot.slane %v74_v45, 2  ;;  %v92_v42 = vsub.f32 %v74_v45, %v90_v36  ;;  %v507_v9 = vld [vmem:[%s941_s8 + $0x8] sm:$0xff] }
  0x6b   :  { %v78_v29 = vadd.f32 %v76_v26, %v73_v25  ;;  %v93_v44 = vmul.f32 1.9364917, %v92_v42  ;;  %347 = vperm.xlu1 %685, %v329_v6  }
  0x6d   :  { %v79_v31 = vmul.f32 0.5, %v78_v29  ;;  %v116_v51 = vrot.slane %v93_v44, 2 }
  0x6f   :  { %v81_v33 = vrot.slane %v79_v31, 7  ;;  %v497_v53 = vrot.slane %v116_v51, 1  ;;  %v576_v60 = vrot.slane %v116_v51, 4  ;;  %337 = vperm.xlu1 %685, %v327_v7  }
  0x71   :  { %v83_v35 = vsub.f32 %v72_v32, %v81_v33 }
  0x73   :  { %v84_v40 = vmul.f32 2.236068, %v83_v35  ;;  %433 = vperm.xlu1 %685, %v425_v8  }
  0x75   :  { %v694_v13 = vpop.eup %693  ;;  %v110_v47 = vrot.slane %v84_v40, 3 }
  0x76   :  { %v696_v14 = vpop.eup %695  ;;  %v245_v15 = vxor.u32 2147483648, %v694_v13 }
  0x77   :  { %v242_v49 = vxor.u32 2147483648, %v696_v14  ;;  %v128_v52 = vsel %vm127_vm10, %v126_v50, %v110_v47  ;;  %515 = vperm.xlu1 %685, %v507_v9  }
  0x78   :  { %v246_v16 = vsel %vm244_vm14, %v245_v15, %v696_v14  ;;  %v130_v30 = vsel %vm129_vm11, %v128_v52, %v113_v48 }
  0x79   :  { %v243_v17 = vsel %vm241_vm3, %v694_v13, %v242_v49  ;;  %v496_v27 = vrot.slane %v130_v30, 1  ;;  %v575_v59 = vrot.slane %v130_v30, 4  ;;  %v690_v30 = vld [vmem:[%s938_s5] sm:$0xff]   ;;  %s604_s5 = sshll.u32 %s728_s16, 4  ;;  %s605_s5 = int_to_ptr.vmem [resolvable:$true] %s604_s5 }
  0x7a   :  { %v247_v18 = vsel %vm240_vm5, %v243_v17, %v246_v16  ;;  %s697_s17 = scalar_lea.vmem %s605_s5, 640  ;;  %p702_p1 = scmp.lt.s32.totalorder %s605_s5, %s605_s5 }
  0x7b   :  { %v248_v19 = vsel %vm238_vm6, nan, %v247_v18  ;;  %v498_v54 = vsel %vm129_vm11, %v496_v27, %v497_v53  ;;  %v501_v63 = vsel %vm129_vm11, %v492_v61, %v496_v27  ;;  %v577_v2 = vsel %vm123_vm4, %v575_v59, %v576_v60  ;;  %p698_p0 = scmp.ne.s32.totalorder %s605_s5, %s697_s17  ;;  %p703_p2 = scmp.lt.s32.totalorder %s697_s17, %s697_s17 }
  0x7c   :  { %v249_v20 = vsel %vm144_vm7, %v248_v19, 0.0  ;;  %v591_v3 = vsel %vm123_vm4, %v573_v58, %v575_v59 }
  0x7d   :  { %v850_v21 = vmul.f32 2.828427, %v249_v20  ;;  %594 = vst [vmem:[#allocation2] sm:$0xff] %v591_v3  ;;  %v503_v20 = vpack.c.bf16 %v498_v54, %v498_v54  ;;  %p704_p3 = por %p703_p2, %p702_p1 }
  0x7e   :  { %v259_v10 = vpop.permute.xlu0 %258 }
  0x7f   :  { %v253_v22 = vpack.c.bf16 %v850_v21, %v850_v21  ;;  %v581_v62 = vrot.slane %v850_v21, 3  ;;  %p705_p4 = pnand %p704_p3, %p698_p0 }
  0x81   :  { %v276_v24 = vsel %vm123_vm4, %v253_v22, 0  ;;  %v592_v4 = vsel %vm125_vm9, %v577_v2, %v581_v62  ;;  %v488_v22 = vrot.slane %v784_v0, 6  ;;  %v689_v0 = vld [vmem:[%s940_s7] sm:$0xff]  }
  0x82   :  { %641 = vmatpush3.bf16.msra.mxu0 %v276_v24  ;;  %595 = vst [vmem:[#allocation2 + $0x8] sm:$0xff] %v592_v4  ;;  %v688_v24 = vld [vmem:[%s936_s3 + $0x8] sm:$0xff]  }
  0x83   :  { %652 = vmatprep.subr.bf16.mxu0 %v719_v1  ;;  %v490_v45 = vsel %vm119_vm2, %v488_v22, %v489_v56 }
  0x84   :  { %v502_v25 = vpack.c.bf16 %v501_v63, %v490_v45 }
  0x85   :  { %643 = vmatmul.mubr.msk.bf16.vlgmr.msra.gmra.mxu0 %vm271_vm8, %v686_v41  ;;  %v528_v41 = vsel %vm123_vm4, %v503_v20, 0 }
  0x86   :  { %656 = vmatprep.mubr.msk.bf16.mxu0 %vm720_vm0, %v719_v1  ;;  %v264_v14 = vpop.permute.xlu0 %263 }
  0x8a   :  { %v333_v35 = vpop.permute.xlu0 %332 }
  0x8e   :  { %v429_v53 = vpop.permute.xlu0 %428 }
  0x92   :  { %v511_v54 = vpop.permute.xlu0 %510 }
  0xe2   :  { %v343_v26 = vpop.permute.xlu1 %342 }
  0xe6   :  { %v348_v29 = vpop.permute.xlu1 %347 }
  0xea   :  { %v338_v37 = vpop.permute.xlu1 %337 }
  0xee   :  { %v434_v28 = vpop.permute.xlu1 %433 }
  0xf2   :  { %v516_v59 = vpop.permute.xlu1 %515 }
 0x145   :  { %v312_v11 = vpop.f32.mrf.mxu0 }
 0x146   :  { %v313_v13 = vadd.f32 %v312_v11, %v259_v10 }
 0x147   :  { %v644_v12 = vpop.f32.mrf.mxu0 }
 0x148   :  { %v319_v17 = vmax.f32 %v313_v13, 0.0 }
 0x149   :  { %v315_v15 = vpop.f32.mrf.mxu0 }
 0x14a   :  { %v316_v49 = vadd.f32 %v315_v15, %v264_v14 }
 0x14b   :  { %v645_v16 = vpop.f32.mrf.mxu0 }
 0x14c   :  { %v320_v18 = vmax.f32 %v316_v49, 0.0 }
 0x14e   :  { %v325_v19 = vpack.c.bf16 %v320_v18, %v319_v17 }
 0x150   :  { %646 = vmatprep.subr.bf16.mxu1 %v325_v19 }
 0x151   :  { %647 = vmatpush3.bf16.msra.mxu1 %v325_v19 }
 0x152   :  { %660 = vmatprep.subr.bf16.mxu1 %v719_v1 }
 0x154   :  { %649 = vmatmul.mubr.msk.bf16.vlgmr.msra.gmra.mxu1 %vm360_vm12, %v688_v24 }
 0x155   :  { %661 = vmatpush3.bf16.msra.mxu1 %v528_v41  ;;  %664 = vmatprep.mubr.msk.bf16.mxu1 %vm720_vm0, %v719_v1  ;;  %vm441_vm0 = vcmask 261120  }
 0x156   :  { %662 = vmatprep.subr.bf16.mxu1 %v719_v1 }
 0x159   :  { %663 = vmatpush3.bf16.msra.mxu1 %v502_v25 }
 0x15c   :  { %665 = vmatmul.mubr.msk.bf16.vlgmr.msra.gmra.mxu1 %vm523_vm13, %v689_v0 }
 0x214   :  { %v650_v31 = vpop.f32.mrf.mxu1 }
 0x215   :  { %v410_v33 = vadd.f32 %v650_v31, %v343_v26 }
 0x216   :  { %v401_v32 = vpop.f32.mrf.mxu1 }
 0x217   :  { %v418_v39 = vmax.f32 %v410_v33, 0.0  ;;  %v402_v40 = vadd.f32 %v401_v32, %v333_v35 }
 0x218   :  { %v651_v34 = vpop.f32.mrf.mxu1 }
 0x219   :  { %v413_v36 = vadd.f32 %v651_v34, %v348_v29  ;;  %v416_v50 = vmax.f32 %v402_v40, 0.0 }
 0x21a   :  { %v404_v38 = vpop.f32.mrf.mxu1 }
 0x21b   :  { %v419_v42 = vmax.f32 %v413_v36, 0.0  ;;  %v405_v23 = vadd.f32 %v404_v38, %v338_v37 }
 0x21c   :  { %v564_v43 = vpop.f32.mrf.mxu1 }
 0x21d   :  { %v423_v44 = vpack.c.bf16 %v419_v42, %v418_v39  ;;  %v417_v47 = vmax.f32 %v405_v23, 0.0  ;;  %v565_v46 = vadd.f32 %v564_v43, %v511_v54 }
 0x21e   :  { %v666_v48 = vpop.f32.mrf.mxu1 }
 0x21f   :  { %653 = vmatpush3.bf16.msra.mxu0 %v423_v44  ;;  %v422_v52 = vpack.c.bf16 %v417_v47, %v416_v50 }
 0x220   :  { %v567_v51 = vpop.f32.mrf.mxu1  ;;  %654 = vmatprep.subr.bf16.mxu0 %v719_v1 }
 0x221   :  { %v568_v1 = vadd.f32 %v567_v51, %v516_v59 }
 0x222   :  { %v667_v27 = vpop.f32.mrf.mxu1 }
 0x223   :  { %655 = vmatpush3.bf16.msra.mxu0 %v422_v52 }
 0x226   :  { %657 = vmatmul.mubr.msk.bf16.vlgmr.msra.gmra.mxu0 %vm441_vm0, %v690_v30 }
 0x2e6   :  { %v479_v55 = vpop.f32.mrf.mxu0 }
 0x2e7   :  { %v480_v56 = vadd.f32 %v479_v55, %v429_v53 }
 0x2e8   :  { %v658_v57 = vpop.f32.mrf.mxu0 }
 0x2e9   :  { %v571_v58 = vmul.f32 %v565_v46, %v480_v56 }
 0x2ea   :  { %v482_v60 = vpop.f32.mrf.mxu0 }
 0x2eb   :  { %v585_v61 = vrot.slane %v571_v58, 3  ;;  %v483_v63 = vadd.f32 %v482_v60, %v434_v28 }
 0x2ec   :  { %v659_v2 = vpop.f32.mrf.mxu0 }
 0x2ed   :  { %v593_v3 = vsel %vm125_vm9, %v581_v62, %v585_v61  ;;  %v572_v4 = vmul.f32 %v568_v1, %v483_v63 }
 0x2ee   :  { %596 = vst [vmem:[#allocation2 + $0x10] sm:$0xff] %v593_v3 }
 0x2ef   :  { %v586_v5 = vrot.slane %v572_v4, 3 }
 0x2f1   :  { %v587_v6 = vsel %vm125_vm9, %v585_v61, %v586_v5  ;;  %598 = vst [vmem:[#allocation2 + $0x20] sm:$0x1f] %v586_v5 }
 0x2f2   :  { %597 = vst [vmem:[#allocation2 + $0x18] sm:$0xff] %v587_v6 }
 0x2f3   :  { %708 = shalt.err (!%p705_p4)
}
 0x2f4   :  { %s729_s18 = smov 128   ;;  %s730_s19 = smov 8  }
 0x2f5   :  { %610 = dma.vmem_to_hbm [thread:$0]  %s605_s5, 640, %s942_s9, [#allocation3], %s729_s18, %s729_s18, %s730_s19  }
 0x2f6   :  { %717 = dma.done.wait [#allocation3], 640  }
 0x2f7   :  { %718 = vsyncadd [#allocation3], 4294966656 }
 0x2f8   :  { %614 = vsyncpa [#allocation3], 1 }

</bundles_post_ra>
